<compile_context>
chip_gen: v7x
topology: tpu7x:2x2x1
jax: 0.10.0
libtpu: 0.0.40
codegen_flags: <defaults>
</compile_context>

<pallas_src>
import functools

import jax
import jax.numpy as jnp
from jax import lax
from jax.experimental import pallas as pl
from jax.experimental.pallas import tpu as pltpu


def attention_kernel(xq_ref, xf_ref, wq_ref, wk_ref, wv_ref, wo_ref, bo_ref,
                     o_ref, k_scratch, v_scratch, *, num_heads, head_dim):
    D = head_dim
    qi = pl.program_id(1)

    # K / V are query-block invariant: project the full sequence once per
    # batch element (qi == 0) into persistent VMEM scratch, reuse afterwards.
    @pl.when(qi == 0)
    def _():
        xf = xf_ref[...]                                    # (N, E) bf16, all rows
        k_scratch[...] = jnp.dot(
            xf, wk_ref[...], preferred_element_type=jnp.float32
        ).astype(jnp.bfloat16)
        v_scratch[...] = jnp.dot(
            xf, wv_ref[...], preferred_element_type=jnp.float32
        ).astype(jnp.bfloat16)

    xq = xq_ref[...]                                        # (TQ, E) bf16, query rows
    TQ, E = xq.shape

    # Fused full-E Q projection (block-diag weight, 1/sqrt(D) pre-folded).
    q = jnp.dot(xq, wq_ref[...],
                preferred_element_type=jnp.float32).astype(jnp.bfloat16)
    k = k_scratch[...]                                      # (N, E) bf16
    v = v_scratch[...]                                      # (N, E) bf16

    wo_t = wo_ref[...]                                      # (E, E) bf16, pre-transposed
    acc = jnp.zeros((TQ, E), dtype=jnp.float32)

    # TODO(synk): for long sequences tile keys flash-style (online softmax) so
    # only one (TQ, TK) score tile is ever resident (matters for v7x 64 MiB VMEM).
    for h in range(num_heads):                              # static unrolled head loop
        qh = q[:, h * D:(h + 1) * D]                        # (TQ, D)
        kh = k[:, h * D:(h + 1) * D]                        # (N,  D)
        vh = v[:, h * D:(h + 1) * D]                        # (N,  D)

        # Scores: contract over D directly, no materialized kh.T (keeps XLU free).
        s = lax.dot_general(qh, kh, (((1,), (1,)), ((), ())),
                            preferred_element_type=jnp.float32)      # (TQ, N)
        m = jnp.max(s, axis=-1, keepdims=True)
        p = jnp.exp(s - m)                                           # f32 softmax numerator
        l = jnp.sum(p, axis=-1, keepdims=True)
        inv_l = pl.reciprocal(l, approx=True)                        # EUP slot, ~free

        oh = jnp.dot(p.astype(jnp.bfloat16), vh,
                     preferred_element_type=jnp.float32)             # (TQ, D)
        oh = oh * inv_l                                              # normalize after PV

        # Accumulate the output projection per head (no lane-axis concatenate).
        acc = acc + jnp.dot(oh.astype(jnp.bfloat16),
                            wo_t[h * D:(h + 1) * D, :],
                            preferred_element_type=jnp.float32)      # (TQ, E)

    o_ref[...] = (acc + bo_ref[...]).astype(o_ref.dtype)             # bias kept in f32


def attention_pallas(x, wq, wk, wv, wo, bo, *, num_heads, q_block=128):
    """x: (B, N, E). wq/wk/wv: (D, D) PyTorch-layout weights (y = x @ W.T).
    wo: (E, E), bo: (E,)."""
    B, N, E = x.shape
    D = E // num_heads
    scale = 1.0 / (D ** 0.5)

    # Block-diagonal full-E projection weights so Q/K/V become single
    # (rows, E) @ (E, E) matmuls.  Kernel computes y = x @ W, so use W.T blocks.
    eye = jnp.eye(num_heads, dtype=jnp.float32)
    wq_full = jnp.kron(eye, wq.astype(jnp.float32).T * scale).astype(jnp.bfloat16)
    wk_full = jnp.kron(eye, wk.astype(jnp.float32).T).astype(jnp.bfloat16)
    wv_full = jnp.kron(eye, wv.astype(jnp.float32).T).astype(jnp.bfloat16)
    wo_t = wo.astype(jnp.float32).T.astype(jnp.bfloat16)
    bo_2d = bo.astype(jnp.float32).reshape(1, E)

    x_bf16 = x.astype(jnp.bfloat16)

    tq = min(N, q_block)
    nq = pl.cdiv(N, tq)

    kernel = functools.partial(attention_kernel, num_heads=num_heads, head_dim=D)

    return pl.pallas_call(
        kernel,
        out_shape=jax.ShapeDtypeStruct((B, N, E), x.dtype),
        grid_spec=pltpu.PrefetchScalarGridSpec(
            num_scalar_prefetch=0,
            grid=(B, nq),
            in_specs=[
                pl.BlockSpec((pl.Squeezed(), tq, E), lambda b, qi: (b, qi, 0)),  # x: query rows
                pl.BlockSpec((pl.Squeezed(), N, E), lambda b, qi: (b, 0, 0)),    # x: all rows (K/V)
                pl.BlockSpec((E, E), lambda b, qi: (0, 0)),   # block-diag Wq^T * scale
                pl.BlockSpec((E, E), lambda b, qi: (0, 0)),   # block-diag Wk^T
                pl.BlockSpec((E, E), lambda b, qi: (0, 0)),   # block-diag Wv^T
                pl.BlockSpec((E, E), lambda b, qi: (0, 0)),   # Wo^T
                pl.BlockSpec((1, E), lambda b, qi: (0, 0)),   # output bias
            ],
            out_specs=pl.BlockSpec((pl.Squeezed(), tq, E), lambda b, qi: (b, qi, 0)),
            scratch_shapes=[
                pltpu.VMEM((N, E), jnp.bfloat16),   # cached K (full sequence, per batch)
                pltpu.VMEM((N, E), jnp.bfloat16),   # cached V (full sequence, per batch)
            ],
        ),
        # Query-block axis carries the K/V scratch -> "arbitrary"; batch stays
        # parallel so small-batch workloads still shard across TensorCores.
        compiler_params=pltpu.CompilerParams(
            dimension_semantics=("parallel", "arbitrary")),
    )(x_bf16, x_bf16, wq_full, wk_full, wv_full, wo_t, bo_2d)


def attention_ref(x, wq, wk, wv, wo, bo, *, num_heads):
    """Pure-JAX f32 reference mirroring the PyTorch forward exactly."""
    B, N, E = x.shape
    D = E // num_heads
    xr = x.reshape(B, N, num_heads, D)
    q = jnp.einsum('bnhd,ed->bnhe', xr, wq)      # nn.Linear: x @ W.T
    k = jnp.einsum('bnhd,ed->bnhe', xr, wk)
    v = jnp.einsum('bnhd,ed->bnhe', xr, wv)
    sim = jnp.einsum('bqhd,bkhd->bhqk', q, k) / (D ** 0.5)
    attn = jax.nn.softmax(sim, axis=-1)
    out = jnp.einsum('bhql,blhd->bqhd', attn, v)
    out = out.reshape(B, N, E)
    return jnp.einsum('bne,fe->bnf', out, wo) + bo


if __name__ == "__main__":
    # Small shapes consistent with the module (embedding divisible by heads).
    # N=16 with q_block=8 -> 2 query blocks, exercising both the qi==0 K/V
    # projection path and the cached-scratch reuse path.
    B, N = 2, 16
    NUM_HEADS = 4
    E = 32
    D = E // NUM_HEADS

    key = jax.random.PRNGKey(0)
    kx, kq, kk, kv, ko, kb = jax.random.split(key, 6)

    x = jax.random.normal(kx, (B, N, E), dtype=jnp.float32)
    # Deterministic synthetic parameters (PyTorch Linear weight layout: (out, in)).
    wq = jax.random.normal(kq, (D, D), dtype=jnp.float32) * 0.1
    wk = jax.random.normal(kk, (D, D), dtype=jnp.float32) * 0.1
    wv = jax.random.normal(kv, (D, D), dtype=jnp.float32) * 0.1
    wo = jax.random.normal(ko, (E, E), dtype=jnp.float32) * 0.1
    bo = jax.random.normal(kb, (E,), dtype=jnp.float32) * 0.1

    out = attention_pallas(x, wq, wk, wv, wo, bo, num_heads=NUM_HEADS, q_block=8)
    out = jax.block_until_ready(out)

    ref = attention_ref(x, wq, wk, wv, wo, bo, num_heads=NUM_HEADS)
    assert out.shape == (B, N, E)
    # bf16 matmul operands -> compare at bf16-appropriate tolerance.
    assert jnp.allclose(out, ref, atol=2e-2, rtol=2e-2), "mismatch vs reference"

    print("KERNEL_OK")
</pallas_src>

<mosaic_0001>
module attributes {stable_mosaic.version = 11 : i64} {
  func.func @attention_kernel(%arg0: i32, %arg1: i32, %arg2: memref<1x8x32xbf16, #tpu.memory_space<vmem>>, %arg3: memref<1x16x32xbf16, #tpu.memory_space<vmem>>, %arg4: memref<32x32xbf16, #tpu.memory_space<vmem>>, %arg5: memref<32x32xbf16, #tpu.memory_space<vmem>>, %arg6: memref<32x32xbf16, #tpu.memory_space<vmem>>, %arg7: memref<32x32xbf16, #tpu.memory_space<vmem>>, %arg8: memref<1x32xf32, #tpu.memory_space<vmem>>, %arg9: memref<1x8x32xf32, #tpu.memory_space<vmem>>, %arg10: memref<16x32xbf16, #tpu.memory_space<vmem>>, %arg11: memref<16x32xbf16, #tpu.memory_space<vmem>>) attributes {dimension_semantics = [#tpu.dimension_semantics<parallel>, #tpu.dimension_semantics<arbitrary>], iteration_bounds = array<i64: 2, 2>, scalar_prefetch = 0 : i64, scratch_operands = 2 : i64, tpu.core_type = #tpu.core_type<tc>, window_params = [{transform_indices = @transform_0, window_bounds = array<i64: 1, 8, 32>}, {transform_indices = @transform_1, window_bounds = array<i64: 1, 16, 32>}, {pipeline_mode = #tpu.pipeline_mode<synchronous>, transform_indices = @transform_2, window_bounds = array<i64: 32, 32>}, {pipeline_mode = #tpu.pipeline_mode<synchronous>, transform_indices = @transform_3, window_bounds = array<i64: 32, 32>}, {pipeline_mode = #tpu.pipeline_mode<synchronous>, transform_indices = @transform_4, window_bounds = array<i64: 32, 32>}, {pipeline_mode = #tpu.pipeline_mode<synchronous>, transform_indices = @transform_5, window_bounds = array<i64: 32, 32>}, {pipeline_mode = #tpu.pipeline_mode<synchronous>, transform_indices = @transform_6, window_bounds = array<i64: 1, 32>}, {transform_indices = @transform_7, window_bounds = array<i64: 1, 8, 32>}]} {
    %c0_i32 = arith.constant 0 : i32
    %0 = arith.cmpi eq, %arg1, %c0_i32 : i32
    %1 = arith.extui %0 : i1 to i32
    %c0_i32_0 = arith.constant 0 : i32
    %2 = arith.cmpi ne, %1, %c0_i32_0 : i32
    scf.if %2 {
      %c0_37 = arith.constant 0 : index
      %c0_38 = arith.constant 0 : index
      %c0_39 = arith.constant 0 : index
      %98 = vector.load %arg3[%c0_37, %c0_38, %c0_39] : memref<1x16x32xbf16, #tpu.memory_space<vmem>>, vector<1x16x32xbf16>
      %99 = vector.shape_cast %98 : vector<1x16x32xbf16> to vector<16x32xbf16>
      %c0_40 = arith.constant 0 : index
      %c0_41 = arith.constant 0 : index
      %100 = vector.load %arg5[%c0_40, %c0_41] : memref<32x32xbf16, #tpu.memory_space<vmem>>, vector<32x32xbf16>
      %cst_42 = arith.constant dense<0.000000e+00> : vector<16x32xf32>
      %101 = tpu.matmul %99, %100, %cst_42 {dimension_numbers = #tpu.dot_dimension_numbers<[1], [0], [0], [1], [0, 0, 1, 1], [], []>} : vector<16x32xbf16>, vector<32x32xbf16>, vector<16x32xf32> -> vector<16x32xf32>
      %102 = arith.truncf %101 : vector<16x32xf32> to vector<16x32xbf16>
      %c0_43 = arith.constant 0 : index
      %c0_44 = arith.constant 0 : index
      %103 = vector.load %arg10[%c0_43, %c0_44] : memref<16x32xbf16, #tpu.memory_space<vmem>>, vector<16x32xbf16>
      tpu.vector_store %arg10[%c0_43, %c0_44], %102 {strides = array<i32>} : memref<16x32xbf16, #tpu.memory_space<vmem>>, vector<16x32xbf16>,
      %c0_45 = arith.constant 0 : index
      %c0_46 = arith.constant 0 : index
      %104 = vector.load %arg6[%c0_45, %c0_46] : memref<32x32xbf16, #tpu.memory_space<vmem>>, vector<32x32xbf16>
      %cst_47 = arith.constant dense<0.000000e+00> : vector<16x32xf32>
      %105 = tpu.matmul %99, %104, %cst_47 {dimension_numbers = #tpu.dot_dimension_numbers<[1], [0], [0], [1], [0, 0, 1, 1], [], []>} : vector<16x32xbf16>, vector<32x32xbf16>, vector<16x32xf32> -> vector<16x32xf32>
      %106 = arith.truncf %105 : vector<16x32xf32> to vector<16x32xbf16>
      %c0_48 = arith.constant 0 : index
      %c0_49 = arith.constant 0 : index
      %107 = vector.load %arg11[%c0_48, %c0_49] : memref<16x32xbf16, #tpu.memory_space<vmem>>, vector<16x32xbf16>
      tpu.vector_store %arg11[%c0_48, %c0_49], %106 {strides = array<i32>} : memref<16x32xbf16, #tpu.memory_space<vmem>>, vector<16x32xbf16>,
    } else {
    }
    %c0 = arith.constant 0 : index
    %c0_1 = arith.constant 0 : index
    %c0_2 = arith.constant 0 : index
    %3 = vector.load %arg2[%c0, %c0_1, %c0_2] : memref<1x8x32xbf16, #tpu.memory_space<vmem>>, vector<1x8x32xbf16>
    %4 = vector.shape_cast %3 : vector<1x8x32xbf16> to vector<8x32xbf16>
    %c0_3 = arith.constant 0 : index
    %c0_4 = arith.constant 0 : index
    %5 = vector.load %arg4[%c0_3, %c0_4] : memref<32x32xbf16, #tpu.memory_space<vmem>>, vector<32x32xbf16>
    %cst = arith.constant dense<0.000000e+00> : vector<8x32xf32>
    %6 = tpu.matmul %4, %5, %cst {dimension_numbers = #tpu.dot_dimension_numbers<[1], [0], [0], [1], [0, 0, 1, 1], [], []>} : vector<8x32xbf16>, vector<32x32xbf16>, vector<8x32xf32> -> vector<8x32xf32>
    %7 = arith.truncf %6 : vector<8x32xf32> to vector<8x32xbf16>
    %c0_5 = arith.constant 0 : index
    %c0_6 = arith.constant 0 : index
    %8 = vector.load %arg10[%c0_5, %c0_6] : memref<16x32xbf16, #tpu.memory_space<vmem>>, vector<16x32xbf16>
    %c0_7 = arith.constant 0 : index
    %c0_8 = arith.constant 0 : index
    %9 = vector.load %arg11[%c0_7, %c0_8] : memref<16x32xbf16, #tpu.memory_space<vmem>>, vector<16x32xbf16>
    %c0_9 = arith.constant 0 : index
    %c0_10 = arith.constant 0 : index
    %10 = vector.load %arg7[%c0_9, %c0_10] : memref<32x32xbf16, #tpu.memory_space<vmem>>, vector<32x32xbf16>
    %cst_11 = arith.constant 0.000000e+00 : f32
    %11 = vector.broadcast %cst_11 : f32 to vector<8x32xf32>
    %12 = vector.extract_strided_slice %7 {offsets = [0, 0], sizes = [8, 8], strides = [1, 1]} : vector<8x32xbf16> to vector<8x8xbf16>
    %13 = vector.extract_strided_slice %8 {offsets = [0, 0], sizes = [16, 8], strides = [1, 1]} : vector<16x32xbf16> to vector<16x8xbf16>
    %14 = vector.extract_strided_slice %9 {offsets = [0, 0], sizes = [16, 8], strides = [1, 1]} : vector<16x32xbf16> to vector<16x8xbf16>
    %cst_12 = arith.constant dense<0.000000e+00> : vector<8x16xf32>
    %15 = tpu.matmul %12, %13, %cst_12 {dimension_numbers = #tpu.dot_dimension_numbers<[1], [1], [0], [0], [0, 0, 1, 0], [], []>} : vector<8x8xbf16>, vector<16x8xbf16>, vector<8x16xf32> -> vector<8x16xf32>
    %cst_13 = arith.constant dense<0xFF800000> : vector<8xf32>
    %16 = vector.multi_reduction <maximumf>, %15, %cst_13 [1] : vector<8x16xf32> to vector<8xf32>
    %17 = vector.shape_cast %16 : vector<8xf32> to vector<8x1xf32>
    %18 = vector.broadcast %17 : vector<8x1xf32> to vector<8x16xf32>
    %19 = arith.subf %15, %18 : vector<8x16xf32>
    %20 = math.exp %19 : vector<8x16xf32>
    %cst_14 = arith.constant dense<0.000000e+00> : vector<8xf32>
    %21 = vector.multi_reduction <add>, %20, %cst_14 [1] : vector<8x16xf32> to vector<8xf32>
    %22 = vector.shape_cast %21 : vector<8xf32> to vector<8x1xf32>
    %23 = tpu.reciprocal %22 {approx = true} : vector<8x1xf32> -> vector<8x1xf32>
    %24 = arith.truncf %20 : vector<8x16xf32> to vector<8x16xbf16>
    %cst_15 = arith.constant dense<0.000000e+00> : vector<8x8xf32>
    %25 = tpu.matmul %24, %14, %cst_15 {dimension_numbers = #tpu.dot_dimension_numbers<[1], [0], [0], [1], [0, 0, 1, 1], [], []>} : vector<8x16xbf16>, vector<16x8xbf16>, vector<8x8xf32> -> vector<8x8xf32>
    %26 = vector.broadcast %23 : vector<8x1xf32> to vector<8x8xf32>
    %27 = arith.mulf %25, %26 : vector<8x8xf32>
    %28 = arith.truncf %27 : vector<8x8xf32> to vector<8x8xbf16>
    %29 = vector.extract_strided_slice %10 {offsets = [0, 0], sizes = [8, 32], strides = [1, 1]} : vector<32x32xbf16> to vector<8x32xbf16>
    %cst_16 = arith.constant dense<0.000000e+00> : vector<8x32xf32>
    %30 = tpu.matmul %28, %29, %cst_16 {dimension_numbers = #tpu.dot_dimension_numbers<[1], [0], [0], [1], [0, 0, 1, 1], [], []>} : vector<8x8xbf16>, vector<8x32xbf16>, vector<8x32xf32> -> vector<8x32xf32>
    %31 = arith.addf %11, %30 : vector<8x32xf32>
    %32 = vector.extract_strided_slice %7 {offsets = [0, 8], sizes = [8, 8], strides = [1, 1]} : vector<8x32xbf16> to vector<8x8xbf16>
    %33 = vector.extract_strided_slice %8 {offsets = [0, 8], sizes = [16, 8], strides = [1, 1]} : vector<16x32xbf16> to vector<16x8xbf16>
    %34 = vector.extract_strided_slice %9 {offsets = [0, 8], sizes = [16, 8], strides = [1, 1]} : vector<16x32xbf16> to vector<16x8xbf16>
    %cst_17 = arith.constant dense<0.000000e+00> : vector<8x16xf32>
    %35 = tpu.matmul %32, %33, %cst_17 {dimension_numbers = #tpu.dot_dimension_numbers<[1], [1], [0], [0], [0, 0, 1, 0], [], []>} : vector<8x8xbf16>, vector<16x8xbf16>, vector<8x16xf32> -> vector<8x16xf32>
    %cst_18 = arith.constant dense<0xFF800000> : vector<8xf32>
    %36 = vector.multi_reduction <maximumf>, %35, %cst_18 [1] : vector<8x16xf32> to vector<8xf32>
    %37 = vector.shape_cast %36 : vector<8xf32> to vector<8x1xf32>
    %38 = vector.broadcast %37 : vector<8x1xf32> to vector<8x16xf32>
    %39 = arith.subf %35, %38 : vector<8x16xf32>
    %40 = math.exp %39 : vector<8x16xf32>
    %cst_19 = arith.constant dense<0.000000e+00> : vector<8xf32>
    %41 = vector.multi_reduction <add>, %40, %cst_19 [1] : vector<8x16xf32> to vector<8xf32>
    %42 = vector.shape_cast %41 : vector<8xf32> to vector<8x1xf32>
    %43 = tpu.reciprocal %42 {approx = true} : vector<8x1xf32> -> vector<8x1xf32>
    %44 = arith.truncf %40 : vector<8x16xf32> to vector<8x16xbf16>
    %cst_20 = arith.constant dense<0.000000e+00> : vector<8x8xf32>
    %45 = tpu.matmul %44, %34, %cst_20 {dimension_numbers = #tpu.dot_dimension_numbers<[1], [0], [0], [1], [0, 0, 1, 1], [], []>} : vector<8x16xbf16>, vector<16x8xbf16>, vector<8x8xf32> -> vector<8x8xf32>
    %46 = vector.broadcast %43 : vector<8x1xf32> to vector<8x8xf32>
    %47 = arith.mulf %45, %46 : vector<8x8xf32>
    %48 = arith.truncf %47 : vector<8x8xf32> to vector<8x8xbf16>
    %49 = vector.extract_strided_slice %10 {offsets = [8, 0], sizes = [8, 32], strides = [1, 1]} : vector<32x32xbf16> to vector<8x32xbf16>
    %cst_21 = arith.constant dense<0.000000e+00> : vector<8x32xf32>
    %50 = tpu.matmul %48, %49, %cst_21 {dimension_numbers = #tpu.dot_dimension_numbers<[1], [0], [0], [1], [0, 0, 1, 1], [], []>} : vector<8x8xbf16>, vector<8x32xbf16>, vector<8x32xf32> -> vector<8x32xf32>
    %51 = arith.addf %31, %50 : vector<8x32xf32>
    %52 = vector.extract_strided_slice %7 {offsets = [0, 16], sizes = [8, 8], strides = [1, 1]} : vector<8x32xbf16> to vector<8x8xbf16>
    %53 = vector.extract_strided_slice %8 {offsets = [0, 16], sizes = [16, 8], strides = [1, 1]} : vector<16x32xbf16> to vector<16x8xbf16>
    %54 = vector.extract_strided_slice %9 {offsets = [0, 16], sizes = [16, 8], strides = [1, 1]} : vector<16x32xbf16> to vector<16x8xbf16>
    %cst_22 = arith.constant dense<0.000000e+00> : vector<8x16xf32>
    %55 = tpu.matmul %52, %53, %cst_22 {dimension_numbers = #tpu.dot_dimension_numbers<[1], [1], [0], [0], [0, 0, 1, 0], [], []>} : vector<8x8xbf16>, vector<16x8xbf16>, vector<8x16xf32> -> vector<8x16xf32>
    %cst_23 = arith.constant dense<0xFF800000> : vector<8xf32>
    %56 = vector.multi_reduction <maximumf>, %55, %cst_23 [1] : vector<8x16xf32> to vector<8xf32>
    %57 = vector.shape_cast %56 : vector<8xf32> to vector<8x1xf32>
    %58 = vector.broadcast %57 : vector<8x1xf32> to vector<8x16xf32>
    %59 = arith.subf %55, %58 : vector<8x16xf32>
    %60 = math.exp %59 : vector<8x16xf32>
    %cst_24 = arith.constant dense<0.000000e+00> : vector<8xf32>
    %61 = vector.multi_reduction <add>, %60, %cst_24 [1] : vector<8x16xf32> to vector<8xf32>
    %62 = vector.shape_cast %61 : vector<8xf32> to vector<8x1xf32>
    %63 = tpu.reciprocal %62 {approx = true} : vector<8x1xf32> -> vector<8x1xf32>
    %64 = arith.truncf %60 : vector<8x16xf32> to vector<8x16xbf16>
    %cst_25 = arith.constant dense<0.000000e+00> : vector<8x8xf32>
    %65 = tpu.matmul %64, %54, %cst_25 {dimension_numbers = #tpu.dot_dimension_numbers<[1], [0], [0], [1], [0, 0, 1, 1], [], []>} : vector<8x16xbf16>, vector<16x8xbf16>, vector<8x8xf32> -> vector<8x8xf32>
    %66 = vector.broadcast %63 : vector<8x1xf32> to vector<8x8xf32>
    %67 = arith.mulf %65, %66 : vector<8x8xf32>
    %68 = arith.truncf %67 : vector<8x8xf32> to vector<8x8xbf16>
    %69 = vector.extract_strided_slice %10 {offsets = [16, 0], sizes = [8, 32], strides = [1, 1]} : vector<32x32xbf16> to vector<8x32xbf16>
    %cst_26 = arith.constant dense<0.000000e+00> : vector<8x32xf32>
    %70 = tpu.matmul %68, %69, %cst_26 {dimension_numbers = #tpu.dot_dimension_numbers<[1], [0], [0], [1], [0, 0, 1, 1], [], []>} : vector<8x8xbf16>, vector<8x32xbf16>, vector<8x32xf32> -> vector<8x32xf32>
    %71 = arith.addf %51, %70 : vector<8x32xf32>
    %72 = vector.extract_strided_slice %7 {offsets = [0, 24], sizes = [8, 8], strides = [1, 1]} : vector<8x32xbf16> to vector<8x8xbf16>
    %73 = vector.extract_strided_slice %8 {offsets = [0, 24], sizes = [16, 8], strides = [1, 1]} : vector<16x32xbf16> to vector<16x8xbf16>
    %74 = vector.extract_strided_slice %9 {offsets = [0, 24], sizes = [16, 8], strides = [1, 1]} : vector<16x32xbf16> to vector<16x8xbf16>
    %cst_27 = arith.constant dense<0.000000e+00> : vector<8x16xf32>
    %75 = tpu.matmul %72, %73, %cst_27 {dimension_numbers = #tpu.dot_dimension_numbers<[1], [1], [0], [0], [0, 0, 1, 0], [], []>} : vector<8x8xbf16>, vector<16x8xbf16>, vector<8x16xf32> -> vector<8x16xf32>
    %cst_28 = arith.constant dense<0xFF800000> : vector<8xf32>
    %76 = vector.multi_reduction <maximumf>, %75, %cst_28 [1] : vector<8x16xf32> to vector<8xf32>
    %77 = vector.shape_cast %76 : vector<8xf32> to vector<8x1xf32>
    %78 = vector.broadcast %77 : vector<8x1xf32> to vector<8x16xf32>
    %79 = arith.subf %75, %78 : vector<8x16xf32>
    %80 = math.exp %79 : vector<8x16xf32>
    %cst_29 = arith.constant dense<0.000000e+00> : vector<8xf32>
    %81 = vector.multi_reduction <add>, %80, %cst_29 [1] : vector<8x16xf32> to vector<8xf32>
    %82 = vector.shape_cast %81 : vector<8xf32> to vector<8x1xf32>
    %83 = tpu.reciprocal %82 {approx = true} : vector<8x1xf32> -> vector<8x1xf32>
    %84 = arith.truncf %80 : vector<8x16xf32> to vector<8x16xbf16>
    %cst_30 = arith.constant dense<0.000000e+00> : vector<8x8xf32>
    %85 = tpu.matmul %84, %74, %cst_30 {dimension_numbers = #tpu.dot_dimension_numbers<[1], [0], [0], [1], [0, 0, 1, 1], [], []>} : vector<8x16xbf16>, vector<16x8xbf16>, vector<8x8xf32> -> vector<8x8xf32>
    %86 = vector.broadcast %83 : vector<8x1xf32> to vector<8x8xf32>
    %87 = arith.mulf %85, %86 : vector<8x8xf32>
    %88 = arith.truncf %87 : vector<8x8xf32> to vector<8x8xbf16>
    %89 = vector.extract_strided_slice %10 {offsets = [24, 0], sizes = [8, 32], strides = [1, 1]} : vector<32x32xbf16> to vector<8x32xbf16>
    %cst_31 = arith.constant dense<0.000000e+00> : vector<8x32xf32>
    %90 = tpu.matmul %88, %89, %cst_31 {dimension_numbers = #tpu.dot_dimension_numbers<[1], [0], [0], [1], [0, 0, 1, 1], [], []>} : vector<8x8xbf16>, vector<8x32xbf16>, vector<8x32xf32> -> vector<8x32xf32>
    %91 = arith.addf %71, %90 : vector<8x32xf32>
    %c0_32 = arith.constant 0 : index
    %c0_33 = arith.constant 0 : index
    %92 = vector.load %arg8[%c0_32, %c0_33] : memref<1x32xf32, #tpu.memory_space<vmem>>, vector<1x32xf32>
    %93 = vector.broadcast %92 : vector<1x32xf32> to vector<8x32xf32>
    %94 = arith.addf %91, %93 : vector<8x32xf32>
    %c0_34 = arith.constant 0 : index
    %c0_35 = arith.constant 0 : index
    %c0_36 = arith.constant 0 : index
    %95 = vector.load %arg9[%c0_34, %c0_35, %c0_36] : memref<1x8x32xf32, #tpu.memory_space<vmem>>, vector<1x8x32xf32>
    %96 = vector.shape_cast %95 : vector<1x8x32xf32> to vector<8x32xf32>
    %97 = vector.shape_cast %94 : vector<8x32xf32> to vector<1x8x32xf32>
    tpu.vector_store %arg9[%c0_34, %c0_35, %c0_36], %97 {strides = array<i32>} : memref<1x8x32xf32, #tpu.memory_space<vmem>>, vector<1x8x32xf32>,
    return
  }
  func.func @transform_0(%arg0: i32, %arg1: i32) -> (i32, i32, i32) {
    %c0_i32 = arith.constant 0 : i32
    %c0_i32_0 = arith.constant 0 : i32
    return %arg0, %arg1, %c0_i32 : i32, i32, i32
  }
  func.func @transform_1(%arg0: i32, %arg1: i32) -> (i32, i32, i32) {
    %c0_i32 = arith.constant 0 : i32
    %c0_i32_0 = arith.constant 0 : i32
    %c0_i32_1 = arith.constant 0 : i32
    return %arg0, %c0_i32, %c0_i32_0 : i32, i32, i32
  }
  func.func @transform_2(%arg0: i32, %arg1: i32) -> (i32, i32) {
    %c0_i32 = arith.constant 0 : i32
    %c0_i32_0 = arith.constant 0 : i32
    %c0_i32_1 = arith.constant 0 : i32
    return %c0_i32, %c0_i32_0 : i32, i32
  }
  func.func @transform_3(%arg0: i32, %arg1: i32) -> (i32, i32) {
    %c0_i32 = arith.constant 0 : i32
    %c0_i32_0 = arith.constant 0 : i32
    %c0_i32_1 = arith.constant 0 : i32
    return %c0_i32, %c0_i32_0 : i32, i32
  }
  func.func @transform_4(%arg0: i32, %arg1: i32) -> (i32, i32) {
    %c0_i32 = arith.constant 0 : i32
    %c0_i32_0 = arith.constant 0 : i32
    %c0_i32_1 = arith.constant 0 : i32
    return %c0_i32, %c0_i32_0 : i32, i32
  }
  func.func @transform_5(%arg0: i32, %arg1: i32) -> (i32, i32) {
    %c0_i32 = arith.constant 0 : i32
    %c0_i32_0 = arith.constant 0 : i32
    %c0_i32_1 = arith.constant 0 : i32
    return %c0_i32, %c0_i32_0 : i32, i32
  }
  func.func @transform_6(%arg0: i32, %arg1: i32) -> (i32, i32) {
    %c0_i32 = arith.constant 0 : i32
    %c0_i32_0 = arith.constant 0 : i32
    %c0_i32_1 = arith.constant 0 : i32
    return %c0_i32, %c0_i32_0 : i32, i32
  }
  func.func @transform_7(%arg0: i32, %arg1: i32) -> (i32, i32, i32) {
    %c0_i32 = arith.constant 0 : i32
    %c0_i32_0 = arith.constant 0 : i32
    return %arg0, %arg1, %c0_i32 : i32, i32, i32
  }
}

</mosaic_0001>

<bundles_post_ra>
// kernel: tpu_custom_call.1
= control target key start
LH: loop header
LB: loop body
LE: loop exit
PB: predicated region body
PF: predicated region fallthrough
CT: control target
= control target key end

     0   :  { %s2588_s0 = inlined_call_operand.hbm [shape: bf16[2,16,32], index: 0, kind: input, shape index: {}]   ;;  %s2589_s1 = inlined_call_operand.hbm [shape: bf16[2,16,32], index: 1, kind: input, shape index: {}]   ;;  %s2590_s2 = inlined_call_operand.hbm [shape: bf16[32,32], index: 2, kind: input, shape index: {}]   ;;  %s2591_s3 = inlined_call_operand.hbm [shape: bf16[32,32], index: 3, kind: input, shape index: {}]   ;;  %s2592_s4 = inlined_call_operand.hbm [shape: bf16[32,32], index: 4, kind: input, shape index: {}]   ;;  %s2593_s5 = inlined_call_operand.vmem [shape: bf16[32,32], index: 5, kind: input, shape index: {}]   ;;  %s2594_s6 = inlined_call_operand.vmem [shape: f32[1,32], index: 6, kind: input, shape index: {}]   ;;  %s2595_s7 = inlined_call_operand.hbm [shape: f32[2,16,32], index: 7, kind: output, shape index: {}]  }
   0x1   :  { %2608 = sst [smem:[#allocation23_spill]] %s2588_s0 }
   0x2   :  { %2609 = sst [smem:[#allocation24_spill]] %s2590_s2 }
   0x3   :  { %2610 = sst [smem:[#allocation25_spill]] %s2591_s3 }
   0x4   :  { %2611 = sst [smem:[#allocation26_spill]] %s2592_s4 }
   0x5   :  { %2612 = sst [smem:[#allocation27_spill]] %s2593_s5 }
   0x6   :  { %2613 = sst [smem:[#allocation28_spill]] %s2594_s6 }
   0x7   :  { %2614 = sst [smem:[#allocation29_spill]] %s2595_s7 }
   0x8   :  { %12 = vsyncpa [#allocation5], 0 }
   0x9   :  { %14 = vsyncpa [#allocation5 + $0x1], 0 }
   0xa   :  { %15 = vsyncpa [#allocation8], 0 }
   0xb   :  { %17 = vsyncpa [#allocation8 + $0x1], 0 }
   0xc   :  { %18 = vsyncpa [#allocation11], 0 }
   0xd   :  { %19 = vsyncpa [#allocation6], 0 }
   0xe   :  { %21 = vsyncpa [#allocation6 + $0x1], 0  ;;  %s2063_s24 = smov 0   ;;  %s2065_s25 = smov 0  }
   0xf   :  { %s2067_s26 = smov 0   ;;  %s2069_s27 = smov 0  }
  0x10   :  { %s2071_s28 = smov 0   ;;  %s2073_s29 = smov 0  }
  0x11   :  { %s2075_s30 = smov 0   ;;  %s2077_s8 = smov 0  }
  0x12   :  { %s2079_s9 = smov 0   ;;  %s2081_s10 = smov 0  }
  0x13   :  { %s2083_s11 = smov 0  }
  0x14 LB: > { %2615 = sst [smem:[#allocation19_spill]] %s1990_s30  ;;  %s2117_s12 = sadd.s32 4294967295, %s2006_s11   ;;  %s2006_s11 = sphi %s2083_s11, %s27_s11   ;;  %s2002_s10 = sphi %s2081_s10, %s2664_s10   ;;  %s1998_s9 = sphi %s2079_s9, %s2663_s9   ;;  %s1994_s8 = sphi %s2077_s8, %s2662_s8   ;;  %s1990_s30 = sphi %s2075_s30, %s2661_s30   ;;  %s1986_s29 = sphi %s2073_s29, %s2660_s29   ;;  %s1982_s28 = sphi %s2071_s28, %s2659_s28   ;;  %s1978_s27 = sphi %s2069_s27, %s2658_s27   ;;  %s1974_s26 = sphi %s2067_s26, %s2657_s26   ;;  %s1970_s25 = sphi %s2065_s25, %s2656_s25   ;;  %s1966_s24 = sphi %s2063_s24, %s2655_s24  }
  0x15   : > { %2616 = sst [smem:[#allocation20_spill]] %s1994_s8  ;;  %p87_p0 = scmp.ne.s32.totalorder %s1970_s25, %s1966_s24 }
  0x16   : > { %p2597_p1 = scmp.eq.s32.totalorder %s2117_s12, 0  ;;  %p1381_p2 = scmp.ge.s32.totalorder %s2006_s11, 1 }
  0x17   : > { %p231_p3 = scmp.lt.s32.totalorder %s2006_s11, 5  ;;  %s2008_s15 = smov [#allocation9]  }
  0x18   : > { %p2125_p4 = por %p87_p0, %p2597_p1  ;;  %s243_s16 = sshll.u32 %s2008_s15, 4  ;;  %s2133_s16 = int_to_ptr.vmem [resolvable:$true] %s243_s16 }
  0x19   : > { %p2129_p5 = pnand %p1381_p2, %p231_p3  ;;  %s2009_s18 = smov [#allocation10]  }
  0x1a   : > { %s2617_s13 = scalar_select %p2125_p4, 1, 0 }
  0x1b   : > { %s2619_s14 = scalar_select %p2129_p5, 1, 0 }
  0x1c   : > { %2618 = sst [smem:[#allocation21_spill]] %s2617_s13  ;;  %p1576_p6 = pneg %p2129_p5 }
  0x1d   : > { %s256_s19 = sshll.u32 %s2009_s18, 4  ;;  %s2010_s20 = smov [#allocation12]   ;;  %s2143_s19 = int_to_ptr.vmem [resolvable:$true] %s256_s19 }
  0x1e   : > { %p2139_p7 = pnand %p1576_p6, %p2597_p1  ;;  %s2145_s21 = sshll.u32 %s2010_s20, 4  ;;  %s270_s21 = int_to_ptr.vmem [resolvable:$true] %s2145_s21 }
  0x1f   : > { %s2621_s2 = sld [smem:[#allocation24_spill]] }
  0x20   : > { %p2155_p9 = pneg %p2139_p7 }
  0x25   : > { %s1728_s24 = scalar_lea.hbm %s2621_s2, 256 }
  0x26   : > { %p1729_p8 = scmp.ne.s32.totalorder %s2621_s2, %s1728_s24  ;;  %p1735_p12 = scmp.lt.u32.totalorder %s1728_s24, %s2621_s2 }
  0x28   : > { %p1731_p10 = pnand %p2155_p9, %p1729_p8 }
  0x2a   : > { %p1732_p11 = pneg %p1731_p10 }
  0x2c   : > { %p1737_p13 = pnand %p1735_p12, %p1732_p11 }
  0x2e   : > { %1740 = shalt.err (!%p1737_p13)
}
  0x2f   : > { %s1741_s7 = scalar_lea.vmem %s2133_s16, 256  ;;  %p1749_p6 = scmp.lt.s32.totalorder %s2133_s16, %s2133_s16 }
  0x30   : > { %p1742_p0 = scmp.ne.s32.totalorder %s2133_s16, %s1741_s7  ;;  %p1750_p1 = scmp.lt.s32.totalorder %s1741_s7, %s1741_s7 }
  0x32   : > { %p1744_p2 = pnand %p1742_p0, %p2155_p9  ;;  %p1751_p8 = por %p1750_p1, %p1749_p6 }
  0x34   : > { %p1745_p3 = pneg %p1744_p2 }
  0x36   : > { %p1752_p10 = pnand %p1751_p8, %p1745_p3 }
  0x38   : > { %1755 = shalt.err (!%p1752_p10)
}
  0x39   : > { %s2603_s22 = smov 64   ;;  %s2604_s23 = smov 4  }
  0x3a   : > { %1579 = dma.hbm_to_vmem [thread:$0]  (!%p2139_p7), %s2621_s2, 256, %s2133_s16, [#allocation8], %s2603_s22, %s2603_s22, %s2604_s23  }
  0x3b   : > { %s2623_s3 = sld [smem:[#allocation25_spill]] }
  0x41   : > { %s1756_s7 = scalar_lea.hbm %s2623_s3, 256 }
  0x42   : > { %p1757_p1 = scmp.ne.s32.totalorder %s2623_s3, %s1756_s7  ;;  %p1763_p13 = scmp.lt.u32.totalorder %s1756_s7, %s2623_s3 }
  0x44   : > { %p1759_p11 = pnand %p1757_p1, %p2155_p9 }
  0x46   : > { %p1760_p12 = pneg %p1759_p11 }
  0x48   : > { %p1765_p0 = pnand %p1763_p13, %p1760_p12 }
  0x4a   : > { %1768 = shalt.err (!%p1765_p0)
}
  0x4b   : > { %s1769_s16 = scalar_lea.vmem %s2143_s19, 256  ;;  %p1777_p8 = scmp.lt.s32.totalorder %s2143_s19, %s2143_s19 }
  0x4c   : > { %p1770_p2 = scmp.ne.s32.totalorder %s2143_s19, %s1769_s16  ;;  %p1778_p10 = scmp.lt.s32.totalorder %s1769_s16, %s1769_s16 }
  0x4e   : > { %p1772_p3 = pnand %p1770_p2, %p2155_p9  ;;  %p1779_p1 = por %p1778_p10, %p1777_p8 }
  0x50   : > { %p1773_p6 = pneg %p1772_p3 }
  0x52   : > { %p1780_p11 = pnand %p1779_p1, %p1773_p6 }
  0x54   : > { %1783 = shalt.err (!%p1780_p11)
}
  0x55   : > { %1582 = dma.hbm_to_vmem [thread:$0]  (!%p2139_p7), %s2623_s3, 256, %s2143_s19, [#allocation11], %s2603_s22, %s2603_s22, %s2604_s23  }
  0x56   : > { %s2624_s4 = sld [smem:[#allocation26_spill]] }
  0x5c   : > { %s1784_s24 = scalar_lea.hbm %s2624_s4, 256 }
  0x5d   : > { %p1785_p12 = scmp.ne.s32.totalorder %s2624_s4, %s1784_s24  ;;  %p1791_p2 = scmp.lt.u32.totalorder %s1784_s24, %s2624_s4 }
  0x5f   : > { %p1787_p13 = pnand %p1785_p12, %p2155_p9 }
  0x61   : > { %p1788_p0 = pneg %p1787_p13 }
  0x63   : > { %p1793_p3 = pnand %p1791_p2, %p1788_p0 }
  0x65   : > { %1796 = shalt.err (!%p1793_p3)
}
  0x66   : > { %s1797_s16 = scalar_lea.vmem %s270_s21, 256  ;;  %p1805_p1 = scmp.lt.s32.totalorder %s270_s21, %s270_s21 }
  0x67   : > { %p1798_p6 = scmp.ne.s32.totalorder %s270_s21, %s1797_s16  ;;  %p1806_p11 = scmp.lt.s32.totalorder %s1797_s16, %s1797_s16 }
  0x69   : > { %p1800_p8 = pnand %p1798_p6, %p2155_p9  ;;  %p1807_p4 = por %p1806_p11, %p1805_p1 }
  0x6b   : > { %p1801_p10 = pneg %p1800_p8 }
  0x6d   : > { %p1808_p5 = pnand %p1807_p4, %p1801_p10 }
  0x6f   : > { %1811 = shalt.err (!%p1808_p5)
}
  0x70   : > { %1585 = dma.hbm_to_vmem [thread:$0]  (!%p2139_p7), %s2624_s4, 256, %s270_s21, [#allocation11], %s2603_s22, %s2603_s22, %s2604_s23  }
  0x71   : > { %s1380_s6 = sadd.s32 4294967294, %s2006_s11   ;;  %s36_s17 = sadd.s32 1, %s1998_s9 }
  0x72   : > { %s39_s30 = sadd.s32 1, %s2002_s10  ;;  %p37_p4 = scmp.ge.s32.totalorder %s36_s17, 2 }
  0x73   : > { %s48_s8 = sadd.s32 1, %s1986_s29  ;;  %p55_p5 = scmp.ne.s32.totalorder %s1986_s29, %s1982_s28 }
  0x74   : > { %p56_p9 = scmp.eq.s32.totalorder %s2006_s11, 0  ;;  %s2666_s17 = smov (%p37_p4, %s36_s17), 0 }
  0x75   : > { %s2668_s30 = smov (!%p37_p4, %s39_s30), %s2002_s10  ;;  %s44_s21 = ssub.s32 %s1998_s9, %s2666_s17 }
  0x76   : > { %p2242_p7 = por %p56_p9, %p55_p5  ;;  %p41_p12 = scmp.ge.s32.totalorder %s2668_s30, 2 }
  0x77   : > { %p61_p13 = scmp.ne.s32.totalorder %s1982_s28, %s1978_s27  ;;  %s74_s24 = sadd.s32 1, %s1974_s26 }
  0x78   : > { %p81_p0 = scmp.ne.s32.totalorder %s1974_s26, %s1970_s25  ;;  %s2670_s30 = smov (%p41_p12, %s2668_s30), 0 }
  0x79   : > { %2626 = sst [smem:[#allocation22_spill]] %s2670_s30  ;;  %p2627_p2 = scmp.eq.s32.totalorder %s2117_s12, 0 }
  0x7a   : > { %p2262_p6 = por %p81_p0, %p56_p9  ;;  %s43_s20 = ssub.s32 %s2002_s10, %s2670_s30 }
  0x7b   : > { %p2258_p3 = por %p2627_p2, %p61_p13  ;;  %p218_p8 = scmp.eq.s32.totalorder %s2117_s12, 3 }
  0x7c   : > { %s45_s7 = sor.u32 %s44_s21, %s43_s20  ;;  %p72_p10 = scmp.eq.s32.totalorder %s43_s20, 0 }
  0x7d   : > { %s2628_s15 = scalar_select %p2258_p3, 1, 0 }
  0x7e   : > { %p46_p1 = scmp.eq.s32.totalorder %s45_s7, 0  ;;  %p2272_p11 = por %p218_p8, %p55_p5 }
  0x7f   : > { %s2277_s19 = scalar_select %p72_p10, %s1974_s26, %s74_s24  }
  0x80   : > { %s2630_s16 = scalar_select %p2272_p11, 1, 0 }
  0x81   : > { %s2280_s5 = scalar_select %p46_p1, %s1986_s29, %s48_s8  }
  0x82   : > { %p224_p4 = scmp.eq.s32.totalorder %s1380_s6, 3  ;;  %p1600_p9 = scmp.lt.s32.totalorder %s2006_s11, 4 }
  0x83   : > { %s289_s22 = sand.u32 1, %s1986_s29   ;;  %s1387_s23 = sshll.u32 %s2002_s10, 1 }
  0x84   : > { %p2288_p12 = por %p224_p4, %p61_p13  ;;  %s1386_s20 = sshll.u32 %s289_s22, 2 }
  0x85   : > { %s298_s7 = sadd.s32 %s1998_s9, %s1387_s23  ;;  %s2632_s0 = sld [smem:[#allocation23_spill]] }
  0x86   : > { %s2631_s21 = scalar_select %p2288_p12, 1, 0 }
  0x87   : > { %s1388_s2 = sshll.u32 %s298_s7, 6  ;;  %s293_s6 = scalar_lea.vmem [#allocation4], %s1386_s20 }
  0x88   : > { %s302_s8 = sshll.u32 %s293_s6, 4  ;;  %p2302_p5 = pnand %p1600_p9, %p2242_p7  ;;  %s2298_s8 = int_to_ptr.vmem [resolvable:$true] %s302_s8 }
  0x89   : > { %p2308_p13 = pnand %p1600_p9, %p2262_p6  ;;  %s290_s4 = scalar_lea.sflag [#allocation5], %s289_s22 }
  0x8a   : > { %p1814_p2 = pneg %p2302_p5 }
  0x8b   : > { %s2296_s24 = scalar_lea.hbm %s2632_s0, %s1388_s2  ;;  %s1817_s18 = scalar_lea.hbm %s2632_s0, 256 }
  0x8c   : > { %s1812_s23 = scalar_lea.hbm %s2296_s24, 64  ;;  %p1818_p6 = scmp.lt.u32.totalorder %s2296_s24, %s2632_s0 }
  0x8d   : > { %p1813_p0 = scmp.ne.s32.totalorder %s2296_s24, %s1812_s23  ;;  %p1819_p10 = scmp.lt.u32.totalorder %s1817_s18, %s1812_s23 }
  0x8e   : > { %p1821_p4 = scmp.lt.u32.totalorder %s1812_s23, %s2296_s24 }
  0x8f   : > { %p1815_p8 = pnand %p1814_p2, %p1813_p0  ;;  %p1820_p1 = por %p1819_p10, %p1818_p6 }
  0x91   : > { %p1816_p7 = pneg %p1815_p8  ;;  %p1822_p9 = por %p1821_p4, %p1820_p1 }
  0x93   : > { %p1823_p12 = pnand %p1822_p9, %p1816_p7 }
  0x95   : > { %1826 = shalt.err (!%p1823_p12)
}
  0x96   : > { %s1827_s22 = scalar_lea.vmem %s2298_s8, 64  ;;  %s2013_s13 = smov [#allocation4]  }
  0x97   : > { %p1828_p0 = scmp.ne.s32.totalorder %s2298_s8, %s1827_s22  ;;  %s1832_s20 = sshll.u32 %s2013_s13, 4  ;;  %s1833_s20 = int_to_ptr.vmem [resolvable:$false] %s1832_s20 }
  0x98   : > { %s1834_s7 = scalar_lea.vmem %s1833_s20, 128  ;;  %p1835_p3 = scmp.lt.s32.totalorder %s2298_s8, %s1833_s20 }
  0x99   : > { %p1830_p8 = pnand %p1828_p0, %p1814_p2  ;;  %p1836_p6 = scmp.lt.s32.totalorder %s1834_s7, %s1827_s22 }
  0x9b   : > { %p1831_p11 = pneg %p1830_p8  ;;  %p1837_p10 = por %p1836_p6, %p1835_p3 }
  0x9d   : > { %p1838_p1 = pnand %p1837_p10, %p1831_p11 }
  0x9f   : > { %1841 = shalt.err (!%p1838_p1)
}
  0xa0   : > { %1589 = dma.hbm_to_vmem [thread:$0]  (!%p2302_p5), %s2296_s24, 64, %s2298_s8, %s290_s4  }
  0xa1   : > { %s311_s23 = sand.u32 1, %s1974_s26   ;;  %s1428_s6 = sshll.u32 %s2002_s10, 7 }
  0xa2   : > { %s1389_s18 = sshll.u32 %s311_s23, 3  ;;  %s2343_s22 = scalar_lea.hbm %s2589_s1, %s1428_s6 }
  0xa3   : > { %s313_s30 = scalar_lea.vmem [#allocation7], %s1389_s18  ;;  %s2635_s7 = sand.u32 1, %s2006_s11  }
  0xa4   : > { %s320_s20 = sshll.u32 %s313_s30, 4  ;;  %s2349_s0 = scalar_lea.sflag [#allocation8], %s2635_s7  ;;  %s2345_s20 = int_to_ptr.vmem [resolvable:$true] %s320_s20 }
  0xa5   : > { %s1842_s24 = scalar_lea.hbm %s2343_s22, 128  ;;  %p1844_p11 = pneg %p2308_p13 }
  0xa6   : > { %p1843_p3 = scmp.ne.s32.totalorder %s2343_s22, %s1842_s24  ;;  %s1847_s4 = scalar_lea.hbm %s2589_s1, 256 }
  0xa7   : > { %p1848_p2 = scmp.lt.u32.totalorder %s2343_s22, %s2589_s1  ;;  %p1849_p7 = scmp.lt.u32.totalorder %s1847_s4, %s1842_s24 }
  0xa8   : > { %p1845_p12 = pnand %p1844_p11, %p1843_p3  ;;  %p1851_p9 = scmp.lt.u32.totalorder %s1842_s24, %s2343_s22 }
  0xa9   : > { %p1850_p4 = por %p1849_p7, %p1848_p2 }
  0xaa   : > { %p1846_p5 = pneg %p1845_p12 }
  0xab   : > { %p1852_p0 = por %p1851_p9, %p1850_p4 }
  0xad   : > { %p1853_p8 = pnand %p1852_p0, %p1846_p5 }
  0xaf   : > { %1856 = shalt.err (!%p1853_p8)
}
  0xb0   : > { %s1857_s6 = scalar_lea.vmem %s2345_s20, 128  ;;  %s2014_s13 = smov [#allocation7]  }
  0xb1   : > { %p1858_p6 = scmp.ne.s32.totalorder %s2345_s20, %s1857_s6  ;;  %s1862_s30 = sshll.u32 %s2014_s13, 4  ;;  %s1863_s30 = int_to_ptr.vmem [resolvable:$false] %s1862_s30 }
  0xb2   : > { %s1864_s7 = scalar_lea.vmem %s1863_s30, 256  ;;  %p1865_p3 = scmp.lt.s32.totalorder %s2345_s20, %s1863_s30 }
  0xb3   : > { %p1860_p10 = pnand %p1858_p6, %p1844_p11  ;;  %p1866_p12 = scmp.lt.s32.totalorder %s1864_s7, %s1857_s6 }
  0xb5   : > { %p1861_p1 = pneg %p1860_p10  ;;  %p1867_p2 = por %p1866_p12, %p1865_p3 }
  0xb7   : > { %p1868_p7 = pnand %p1867_p2, %p1861_p1 }
  0xb9   : > { %1871 = shalt.err (!%p1868_p7)
}
  0xba   : > { %s2636_s24 = smov 4   ;;  %s2637_s8 = smov 64  }
  0xbb   : > { %1592 = dma.hbm_to_vmem [thread:$0]  (!%p2308_p13), %s2343_s22, 128, %s2345_s20, %s2349_s0, %s2637_s8, %s2637_s8, %s2636_s24  }
  0xbc   : > { %p2638_p11 = scmp.ne.s32.totalorder %s2619_s14, 0 }
  0xbd   : > { %s2383_s2 = sand.u32 (!%p2638_p11), 1, %s1982_s28   ;;  %p2639_p5 = scmp.ne.s32.totalorder (!%p2638_p11), %s2628_s15, 0 }
  0xbe   : > { %332 = sbr.rel (%p2638_p11) target bundleno = 2579 (0xa13), region = 48  ;;  %s1393_s4 = sshll.u32 (!%p2638_p11), %s2383_s2, 2 }
  0xbf   : > { %s335_s23 = scalar_lea.sflag (!%p2638_p11), [#allocation5], %s2383_s2  ;;  %s2387_s18 = scalar_lea.vmem (!%p2638_p11), [#allocation4], %s1393_s4 }
  0xc5   : > { %1945 = dma.done.wait (%p2639_p5), %s335_s23, 64  }
  0xc6   : > { %1947 = vsyncadd (%p2639_p5), %s335_s23, 4294967232  ;;  %s2640_s0 = sld [smem:[#allocation21_spill]]  ;;  %s343_s14 = sand.u32 1, %s2117_s12  }
  0xc7   : > { %s345_s3 = sand.u32 1, %s1970_s25   ;;  %s344_s20 = scalar_lea.sflag [#allocation8], %s343_s14 }
  0xc8   : > { %s1394_s22 = sshll.u32 %s345_s3, 3 }
  0xc9   : > { %s347_s6 = scalar_lea.vmem [#allocation7], %s1394_s22 }
  0xcc   : > { %p2641_p13 = scmp.ne.s32.totalorder %s2640_s0, 0 }
  0xce   : > { %1949 = dma.done.wait (%p2641_p13), %s344_s20, 128  }
  0xcf   : > { %1951 = vsyncadd (%p2641_p13), %s344_s20, 4294967168  ;;  %p2642_p4 = scmp.eq.s32.totalorder %s2117_s12, 0 }
  0xd1   : > { %1953 = dma.done.wait (%p2642_p4), [#allocation8], 256   ;;  %p2643_p9 = pmov %p2642_p4 }
  0xd2   : > { %p2644_p0 = pmov %p2642_p4 }
  0xd3   : > { %1955 = vsyncadd (%p2643_p9), [#allocation8], 4294967040 }
  0xd4   : > { %1957 = dma.done.wait (%p2644_p0), [#allocation11], 512   ;;  %p2645_p8 = pmov %p2644_p0 }
  0xd5   : > { %s1398_s15 = sshll.u32 %s2383_s2, 3  ;;  %s2646_s30 = sld [smem:[#allocation19_spill]] }
  0xd6   : > { %1959 = vsyncadd (%p2645_p8), [#allocation11], 4294966784  ;;  %s2408_s13 = scalar_lea.vmem [#allocation13], %s1398_s15 }
  0xdb   : > { %p1399_p6 = scmp.ne.s32.totalorder %s2646_s30, 0 }
  0xdc   : > { %v1705_v0 = vld [vmem:[#allocation10] sm:$0xff] (!%p1399_p6)   ;;  %v2015_v1 = vmov (!%p1399_p6), 0.0   ;;  %v1706_v2 = vld [vmem:[#allocation12] sm:$0xff] (!%p1399_p6)   ;;  %v1707_v3 = vld [vmem:[#allocation10 + $0x8] sm:$0xff] (!%p1399_p6)   ;;  %vm2016_vm0 = vmmov (!%p1399_p6), 0   ;;  %vm423_vm1 = vcmask (!%p1399_p6), 261120  }
  0xdd   : > { %399 = sbr.rel (%p1399_p6) target bundleno = 447 (0x1bf), region = 72  ;;  %1462 = vmatprep.subr.bf16.mxu0 (!%p1399_p6), %v2015_v1  ;;  %1470 = vmatprep.subr.bf16.mxu1 (!%p1399_p6), %v2015_v1  ;;  %v1708_v4 = vld [vmem:[#allocation12 + $0x8] sm:$0xff] (!%p1399_p6)   ;;  %v1709_v5 = vld [vmem:[%s347_s6] sm:$0xff] (!%p1399_p6)  }
  0xde   : > { %1463 = vmatpush3.bf16.msra.mxu0 (!%p1399_p6), %v1705_v0  ;;  %1466 = vmatprep.mubr.msk.bf16.mxu0 (!%p1399_p6), %vm2016_vm0, %v2015_v1 }
  0xdf   : > { %1471 = vmatpush3.bf16.msra.mxu1 (!%p1399_p6), %v1706_v2  ;;  %1464 = vmatprep.subr.bf16.mxu0 (!%p1399_p6), %v2015_v1 }
  0xe0   : > { %1472 = vmatprep.subr.bf16.mxu1 (!%p1399_p6), %v2015_v1  ;;  %1474 = vmatprep.mubr.msk.bf16.mxu1 (!%p1399_p6), %vm2016_vm0, %v2015_v1 }
  0xe2   : > { %1465 = vmatpush3.bf16.msra.mxu0 (!%p1399_p6), %v1707_v3 }
  0xe3   : > { %1473 = vmatpush3.bf16.msra.mxu1 (!%p1399_p6), %v1708_v4 }
  0xe5   : > { %1467 = vmatmul.mubr.msk.bf16.vlgmr.msra.gmra.mrb[0].mxu0 %vm423_vm1, %v1709_v5 }
  0xe6   : > { %1475 = vmatmul.mubr.msk.bf16.vlgmr.msra.gmra.mrb[0].mxu1 %vm423_vm1, %v1709_v5 }
 0x1b8   : > { %v461_v6 = vpop.f32.mrb[0].mxu0 }
 0x1b9   : > { %v520_v7 = vpop.f32.mrb[0].mxu1  ;;  %v1468_v8 = vpop.f32.mrb[1].mxu0 }
 0x1ba   : > { %v1476_v9 = vpop.f32.mrb[1].mxu1  ;;  %v464_v10 = vpop.f32.mrb[2].mxu0 }
 0x1bb   : > { %v468_v11 = vpack.c.bf16 %v464_v10, %v461_v6  ;;  %v523_v12 = vpop.f32.mrb[2].mxu1  ;;  %v1469_v13 = vpop.f32.mrb[3].mxu0 }
 0x1bc   : > { %v527_v14 = vpack.c.bf16 %v523_v12, %v520_v7  ;;  %v1477_v15 = vpop.f32.mrb[3].mxu1 }
 0x1bd   : > { %469 = vst.msk [vmem:[#allocation2] sm:$0xff] %vm423_vm1, %v468_v11 }
 0x1be   : > { %528 = vst.msk [vmem:[#allocation3] sm:$0xff] %vm423_vm1, %v527_v14 }
 0x1bf PF: > { %v1710_v16 = vld [vmem:[#allocation9] sm:$0xff]   ;;  %v2017_v17 = vmov 0.0   ;;  %v1711_v18 = vld [vmem:[#allocation9 + $0x8] sm:$0xff]   ;;  %vm2018_vm2 = vmmov 0   ;;  %vm597_vm3 = vcmask 64512   ;;  %s2019_s12 = smov 120  }
 0x1c0   : > { %1478 = vmatprep.subr.bf16.mxu0 %v2017_v17  ;;  %1486 = vmatprep.subr.bf16.mxu1 %v2017_v17  ;;  %v529_v21 = vld [vmem:[%s2387_s18] sm:$0xf]  ;;  %vm546_vm4 = vcmask 261120   ;;  %s2020_s7 = smov 112   ;;  %vm644_vm5 = vcmask 130048   ;;  %s2021_s24 = smov 104  }
 0x1c1   : > { %1479 = vmatpush3.bf16.msra.mxu0 %v1710_v16  ;;  %1482 = vmatprep.mubr.msk.bf16.mxu0 %vm2018_vm2, %v2017_v17  ;;  %s2647_s23 = sld [smem:[#allocation27_spill]]  ;;  %vm816_vm6 = vcmask 1043456   ;;  %s2648_s6 = sld [smem:[#allocation20_spill]] }
 0x1c2   : > { %1480 = vmatprep.subr.bf16.mxu0 %v2017_v17  ;;  %1488 = vmatprep.mubr.msk.bf16.mxu1 %vm2018_vm2, %v2017_v17  ;;  %s2649_s15 = sld [smem:[#allocation19_spill]]  ;;  %s2650_s8 = sld [smem:[#allocation28_spill]] }
 0x1c3   : > { %s1243_s18 = sshll.u32 %s2408_s13, 4  ;;  %s2651_s3 = sld [smem:[#allocation29_spill]]  ;;  %s2525_s18 = int_to_ptr.vmem [resolvable:$true] %s1243_s18 }
 0x1c4   : > { %v2415_v19 = vld [vmem:[#allocation2] sm:$0xff]  ;;  %s1228_s20 = scalar_lea.sflag [#allocation6], %s2383_s2  ;;  %p2652_p1 = scmp.ne.s32.totalorder %s2630_s16, 0 }
 0x1c5   : > { %705 = vrot.lane.b32.xlu0 %v2415_v19, %s2019_s12  ;;  %v602_v20 = vsel %vm597_vm3, %v2415_v19, 0  ;;  %1481 = vmatpush3.bf16.msra.mxu0 %v1711_v18  ;;  %v2437_v30 = vld [vmem:[#allocation3] sm:$0xff] }
 0x1c6   : > { %1487 = vmatpush3.bf16.xpose.msra.mxu1 %v602_v20  ;;  %1492 = vmatprep.subr.bf16.mxu0 %v2017_v17 }
 0x1c7   : > { %1498 = vmatprep.subr.bf16.mxu1 %v2017_v17  ;;  %v593_v51 = vld [vmem:[%s2647_s23] sm:$0xf]  ;;  %v594_v56 = vld [vmem:[%s2647_s23 + $0x4] sm:$0xf]  ;;  %s1424_s30 = sshll.u32 %s2648_s6, 1  ;;  %s1872_s6 = scalar_lea.vmem %s2525_s18, 128 }
 0x1c8   : > { %1483 = vmatmul.mubr.msk.bf16.vlgmr.msra.gmra.mrb[0].mxu0 %vm546_vm4, %v529_v21  ;;  %v864_v55 = vsel %vm816_vm6, %v593_v51, 0  ;;  %v818_v57 = vsel %vm816_vm6, %v594_v56, 0  ;;  %p1873_p10 = scmp.ne.s32.totalorder %s2525_s18, %s1872_s6 }
 0x1c9   : > { %1494 = vmatprep.mubr.msk.bf16.mxu0 %vm2018_vm2, %v2017_v17  ;;  %1493 = vmatpush3.bf16.msra.mxu0 %v2437_v30 }
 0x1ca   : > { %1504 = vmatprep.subr.bf16.mxu0 %v2017_v17  ;;  %p1874_p3 = pnand %p1873_p10, %p2652_p1 }
 0x1cc   : > { %p1875_p12 = pneg %p1874_p3 }
 0x237   : > { %v706_v22 = vpop.permute.xlu0 %705 }
 0x238   : > { %v711_v26 = vsel %vm597_vm3, %v706_v22, 0 }
 0x29b   : > { %v584_v23 = vpop.f32.mrb[0].mxu0 }
 0x29c   : > { %v590_v24 = vpack.c.bf16 %v584_v23, %v584_v23  ;;  %v1484_v25 = vpop.f32.mrb[1].mxu0 }
 0x29d   : > { %v587_v27 = vpop.f32.mrb[2].mxu0 }
 0x29e   : > { %702 = vrot.lane.b32.xlu0 %v590_v24, %s2019_s12  ;;  %v1485_v28 = vpop.f32.mrb[3].mxu0  ;;  %1489 = vmatmul.mubr.msk.bf16.vlgmr.msra.gmra.mrb[0].mxu1 %vm597_vm3, %v590_v24 }
 0x29f   : > { %1499 = vmatpush3.bf16.xpose.msra.mxu1 %v711_v26  ;;  %1500 = vmatprep.mubr.msk.bf16.mxu1 %vm2018_vm2, %v2017_v17 }
 0x2a0   : > { %1510 = vmatprep.subr.bf16.mxu1 %v2017_v17 }
 0x2a2   : > { %765 = vrot.lane.b32.xlu0 %v2437_v30, %s2019_s12  ;;  %s1239_s12 = sadd.s32 %s2649_s15, %s1424_s30  ;;  %s2022_s15 = smov [#allocation13]  }
 0x2a3   : > { %s1425_s4 = sshll.u32 %s1239_s12, 7  ;;  %s1876_s30 = sshll.u32 %s2022_s15, 4  ;;  %s1877_s30 = int_to_ptr.vmem [resolvable:$false] %s1876_s30 }
 0x2a4   : > { %s2523_s22 = scalar_lea.hbm %s2651_s3, %s1425_s4  ;;  %s1878_s12 = scalar_lea.vmem %s1877_s30, 256 }
 0x2a5   : > { %p1879_p2 = scmp.lt.s32.totalorder %s2525_s18, %s1877_s30  ;;  %p1880_p7 = scmp.lt.s32.totalorder %s1878_s12, %s1872_s6 }
 0x2a6   : > { %908 = vrot.lane.b32.xlu0 %v2415_v19, %s2020_s7 }
 0x2a7   : > { %p1881_p11 = por %p1880_p7, %p1879_p2 }
 0x2a9   : > { %p1882_p5 = pnand %p1881_p11, %p1875_p12 }
 0x310   : > { %v703_v29 = vpop.permute.xlu0 %702 }
 0x311   : > { %1501 = vmatmul.mubr.msk.bf16.vlgmr.msra.gmra.mrb[4].mxu1 %vm597_vm3, %v703_v29 }
 0x312   : > { %1512 = vmatprep.mubr.msk.bf16.mxu1 %vm2018_vm2, %v2017_v17  ;;  %1511 = vmatpush3.bf16.msra.mxu1 %v818_v57 }
 0x313   : > { %1522 = vmatprep.subr.bf16.mxu1 %v2017_v17 }
 0x314   : > { %v766_v47 = vpop.permute.xlu0 %765 }
 0x318   : > { %v909_v58 = vpop.permute.xlu0 %908 }
 0x319   : > { %v914_v10 = vsel %vm597_vm3, %v909_v58, 0 }
 0x371   : > { %v638_v31 = vpop.f32.mrb[0].mxu1 }
 0x372   : > { %v1490_v32 = vpop.f32.mrb[1].mxu1  ;;  %v645_v33 = vsel %vm644_vm5, %v638_v31, -inf }
 0x373   : > { %646 = vmax.xlane.f32.xlu1 %v645_v33  ;;  %v641_v34 = vpop.f32.mrb[2].mxu1 }
 0x374   : > { %v1491_v35 = vpop.f32.mrb[3].mxu1 }
 0x3e4   : > { %v747_v36 = vpop.f32.mrb[4].mxu1 }
 0x3e5   : > { %v1502_v37 = vpop.f32.mrb[5].mxu1  ;;  %v753_v38 = vsel %vm644_vm5, %v747_v36, -inf }
 0x3e6   : > { %754 = vmax.xlane.f32.xlu1 %v753_v38  ;;  %v750_v39 = vpop.f32.mrb[6].mxu1 }
 0x3e7   : > { %v1503_v40 = vpop.f32.mrb[7].mxu1  ;;  %v595_v39 = vld [vmem:[%s2647_s23 + $0x8] sm:$0xf] }
 0x3e8   : > { %v1019_v40 = vsel %vm816_vm6, %v595_v39, 0 }
 0x400   : > { %v647_v41 = vpop.xlane.xlu1 %646 }
 0x401   : > { %v648_v42 = vsub.f32 %v638_v31, %v647_v41 }
 0x403   : > { %v649_v43 = vmul.f32 1.442695, %v648_v42 }
 0x405   : > { %1712 = vpow2.f32 %v649_v43 }
 0x40f   : > { %v1713_v44 = vpop.eup %1712 }
 0x410   : > { %v651_v45 = vsel %vm644_vm5, %v1713_v44, 0.0  ;;  %v655_v46 = vpack.c.bf16 %v1713_v44, %v1713_v44 }
 0x411   : > { %652 = vadd.xlane.f32.xlu0 %v651_v45 }
 0x412   : > { %1495 = vmatmul.mubr.msk.bf16.vlgmr.msra.gmra.mrb[4].mxu0 %vm644_vm5, %v655_v46 }
 0x413   : > { %1505 = vmatpush3.bf16.msra.mxu0 %v766_v47  ;;  %1506 = vmatprep.mubr.msk.bf16.mxu0 %vm2018_vm2, %v2017_v17 }
 0x414   : > { %1516 = vmatprep.subr.bf16.mxu0 %v2017_v17 }
 0x427   : > { %967 = vrot.lane.b32.xlu0 %v2437_v30, %s2020_s7 }
 0x42b   : > { %1062 = vrot.lane.b32.xlu0 %v590_v24, %s2021_s24 }
 0x473   : > { %v755_v48 = vpop.xlane.xlu1 %754 }
 0x474   : > { %v756_v49 = vsub.f32 %v747_v36, %v755_v48 }
 0x476   : > { %v757_v50 = vmul.f32 1.442695, %v756_v49 }
 0x478   : > { %1714 = vpow2.f32 %v757_v50 }
 0x482   : > { %v1715_v52 = vpop.eup %1714 }
 0x483   : > { %v759_v53 = vsel %vm644_vm5, %v1715_v52, 0.0  ;;  %v763_v54 = vpack.c.bf16 %v1715_v52, %v1715_v52 }
 0x484   : > { %760 = vadd.xlane.f32.xlu1 %v759_v53 }
 0x485   : > { %1507 = vmatmul.mubr.msk.bf16.vlgmr.msra.gmra.mrb[8].mxu0 %vm644_vm5, %v763_v54 }
 0x486   : > { %1517 = vmatpush3.bf16.msra.mxu0 %v864_v55  ;;  %1518 = vmatprep.mubr.msk.bf16.mxu0 %vm2018_vm2, %v2017_v17 }
 0x487   : > { %1528 = vmatprep.subr.bf16.mxu0 %v2017_v17 }
 0x495   : > { %906 = vrot.lane.b32.xlu1 %v590_v24, %s2020_s7 }
 0x49e   : > { %v653_v59 = vpop.xlane.xlu0 %652 }
 0x49f   : > { %1716 = vrcp.f32 %v653_v59 }
 0x4a2   : > { %v968_v3 = vpop.permute.xlu0 %967 }
 0x4a9   : > { %v1717_v60 = vpop.eup %1716 }
 0x4e5   : > { %v693_v61 = vpop.f32.mrb[4].mxu0 }
 0x4e6   : > { %v699_v62 = vmul.f32 %v1717_v60, %v693_v61  ;;  %v1496_v63 = vpop.f32.mrb[5].mxu0 }
 0x4e7   : > { %v696_v0 = vpop.f32.mrb[6].mxu0 }
 0x4e8   : > { %v700_v1 = vpack.c.bf16 %v699_v62, %v699_v62  ;;  %v1497_v2 = vpop.f32.mrb[7].mxu0 }
 0x4ea   : > { %1519 = vmatmul.mubr.msk.bf16.vlgmr.msra.gmra.mrb[12].mxu0 %vm597_vm3, %v700_v1 }
 0x4eb   : > { %1529 = vmatpush3.bf16.msra.mxu0 %v968_v3  ;;  %1530 = vmatprep.mubr.msk.bf16.mxu0 %vm2018_vm2, %v2017_v17 }
 0x4ec   : > { %1540 = vmatprep.subr.bf16.mxu0 %v2017_v17 }
 0x511   : > { %v761_v4 = vpop.xlane.xlu1 %760 }
 0x512   : > { %1718 = vrcp.f32 %v761_v4 }
 0x515   : > { %v907_v13 = vpop.permute.xlu1 %906 }
 0x51c   : > { %v1719_v5 = vpop.eup %1718 }
 0x558   : > { %v805_v6 = vpop.f32.mrb[8].mxu0 }
 0x559   : > { %v811_v7 = vmul.f32 %v1719_v5, %v805_v6  ;;  %v1508_v8 = vpop.f32.mrb[9].mxu0 }
 0x55a   : > { %v808_v9 = vpop.f32.mrb[10].mxu0 }
 0x55b   : > { %v812_v11 = vpack.c.bf16 %v811_v7, %v811_v7  ;;  %v1509_v12 = vpop.f32.mrb[11].mxu0 }
 0x55d   : > { %1513 = vmatmul.mubr.msk.bf16.vlgmr.msra.gmra.mrb[8].mxu1 %vm597_vm3, %v812_v11  ;;  %v1422_v11 = vld [vmem:[%s2650_s8] ss:$0 sm:$0xff] }
 0x55e   : > { %1523 = vmatpush3.bf16.xpose.msra.mxu1 %v914_v10  ;;  %1524 = vmatprep.mubr.msk.bf16.mxu1 %vm2018_vm2, %v2017_v17 }
 0x55f   : > { %1534 = vmatprep.subr.bf16.mxu1 %v2017_v17 }
 0x565   : > { %1525 = vmatmul.mubr.msk.bf16.vlgmr.msra.gmra.mrb[12].mxu1 %vm597_vm3, %v907_v13 }
 0x566   : > { %1536 = vmatprep.mubr.msk.bf16.mxu1 %vm2018_vm2, %v2017_v17  ;;  %1535 = vmatpush3.bf16.msra.mxu1 %v1019_v40 }
 0x567   : > { %1546 = vmatprep.subr.bf16.mxu1 %v2017_v17 }
 0x5bd   : > { %v900_v14 = vpop.f32.mrb[12].mxu0 }
 0x5be   : > { %v1520_v15 = vpop.f32.mrb[13].mxu0 }
 0x5bf   : > { %v903_v16 = vpop.f32.mrb[14].mxu0 }
 0x5c0   : > { %v1521_v18 = vpop.f32.mrb[15].mxu0 }
 0x630   : > { %v854_v20 = vpop.f32.mrb[8].mxu1 }
 0x631   : > { %v2481_v21 = vadd.f32 %v900_v14, %v854_v20  ;;  %v1514_v22 = vpop.f32.mrb[9].mxu1 }
 0x632   : > { %v857_v23 = vpop.f32.mrb[10].mxu1 }
 0x633   : > { %v1515_v24 = vpop.f32.mrb[11].mxu1 }
 0x638   : > { %v950_v25 = vpop.f32.mrb[12].mxu1 }
 0x639   : > { %v1526_v26 = vpop.f32.mrb[13].mxu1  ;;  %v956_v27 = vsel %vm644_vm5, %v950_v25, -inf }
 0x63a   : > { %957 = vmax.xlane.f32.xlu1 %v956_v27  ;;  %v953_v28 = vpop.f32.mrb[14].mxu1 }
 0x63b   : > { %v1527_v29 = vpop.f32.mrb[15].mxu1 }
 0x64b   : > { %1064 = vrot.lane.b32.xlu1 %v2415_v19, %s2021_s24  ;;  %v1063_v19 = vpop.permute.xlu0 %1062 }
 0x6c7   : > { %v958_v31 = vpop.xlane.xlu1 %957 }
 0x6c8   : > { %v959_v32 = vsub.f32 %v950_v25, %v958_v31 }
 0x6ca   : > { %v960_v33 = vmul.f32 1.442695, %v959_v32 }
 0x6cb   : > { %v1065_v34 = vpop.permute.xlu1 %1064 }
 0x6cc   : > { %1720 = vpow2.f32 %v960_v33  ;;  %v1070_v36 = vsel %vm597_vm3, %v1065_v34, 0 }
 0x6d6   : > { %v1721_v35 = vpop.eup %1720 }
 0x6d7   : > { %v962_v37 = vsel %vm644_vm5, %v1721_v35, 0.0  ;;  %v966_v38 = vpack.c.bf16 %v1721_v35, %v1721_v35 }
 0x6d8   : > { %963 = vadd.xlane.f32.xlu0 %v962_v37 }
 0x6d9   : > { %1531 = vmatmul.mubr.msk.bf16.vlgmr.msra.gmra.mrb[16].mxu0 %vm644_vm5, %v966_v38 }
 0x6da   : > { %1541 = vmatpush3.bf16.xpose.msra.mxu0 %v1070_v36  ;;  %1542 = vmatprep.mubr.msk.bf16.mxu0 %vm2018_vm2, %v2017_v17 }
 0x6db   : > { %1552 = vmatprep.subr.bf16.mxu0 %v2017_v17 }
 0x6e1   : > { %1543 = vmatmul.mubr.msk.bf16.vlgmr.msra.gmra.mrb[20].mxu0 %vm597_vm3, %v1063_v19 }
 0x6e2   : > { %1554 = vmatprep.mubr.msk.bf16.mxu0 %vm2018_vm2, %v2017_v17 }
 0x6ee   : > { %1123 = vrot.lane.b32.xlu0 %v2437_v30, %s2021_s24 }
 0x765   : > { %v964_v41 = vpop.xlane.xlu0 %963 }
 0x766   : > { %1722 = vrcp.f32 %v964_v41 }
 0x769   : > { %v1124_v53 = vpop.permute.xlu0 %1123 }
 0x770   : > { %v1723_v42 = vpop.eup %1722 }
 0x7ac   : > { %v1007_v43 = vpop.f32.mrb[16].mxu0 }
 0x7ad   : > { %v1013_v44 = vmul.f32 %v1723_v42, %v1007_v43  ;;  %v1532_v45 = vpop.f32.mrb[17].mxu0 }
 0x7ae   : > { %v1010_v46 = vpop.f32.mrb[18].mxu0 }
 0x7af   : > { %v1014_v47 = vpack.c.bf16 %v1013_v44, %v1013_v44  ;;  %v1533_v48 = vpop.f32.mrb[19].mxu0 }
 0x7b1   : > { %1537 = vmatmul.mubr.msk.bf16.vlgmr.msra.gmra.mrb[16].mxu1 %vm597_vm3, %v1014_v47 }
 0x7b2   : > { %1548 = vmatprep.mubr.msk.bf16.mxu1 %vm2018_vm2, %v2017_v17  ;;  %1547 = vmatpush3.bf16.msra.mxu1 %v1124_v53  ;;  %v596_v17 = vld [vmem:[%s2647_s23 + $0xc] sm:$0xf] }
 0x7b3   : > { %v1175_v60 = vsel %vm816_vm6, %v596_v17, 0 }
 0x7b4   : > { %v1106_v30 = vpop.f32.mrb[20].mxu0  ;;  %1553 = vmatpush3.bf16.msra.mxu0 %v1175_v60 }
 0x7b5   : > { %v1544_v49 = vpop.f32.mrb[21].mxu0  ;;  %v1112_v50 = vsel %vm644_vm5, %v1106_v30, -inf }
 0x7b6   : > { %1113 = vmax.xlane.f32.xlu1 %v1112_v50  ;;  %v1109_v51 = vpop.f32.mrb[22].mxu0 }
 0x7b7   : > { %v1545_v52 = vpop.f32.mrb[23].mxu0 }
 0x843   : > { %v1114_v54 = vpop.xlane.xlu1 %1113 }
 0x844   : > { %v1115_v55 = vsub.f32 %v1106_v30, %v1114_v54 }
 0x846   : > { %v1116_v56 = vmul.f32 1.442695, %v1115_v55 }
 0x848   : > { %1724 = vpow2.f32 %v1116_v56 }
 0x852   : > { %v1725_v57 = vpop.eup %1724 }
 0x853   : > { %v1118_v58 = vsel %vm644_vm5, %v1725_v57, 0.0  ;;  %v1122_v59 = vpack.c.bf16 %v1725_v57, %v1725_v57 }
 0x854   : > { %1119 = vadd.xlane.f32.xlu1 %v1118_v58 }
 0x855   : > { %1549 = vmatmul.mubr.msk.bf16.vlgmr.msra.gmra.mrb[20].mxu1 %vm644_vm5, %v1122_v59 }
 0x884   : > { %v1055_v61 = vpop.f32.mrb[16].mxu1 }
 0x885   : > { %v1061_v62 = vadd.f32 %v1055_v61, %v2481_v21  ;;  %v1538_v63 = vpop.f32.mrb[17].mxu1 }
 0x886   : > { %v1058_v0 = vpop.f32.mrb[18].mxu1 }
 0x887   : > { %v1539_v1 = vpop.f32.mrb[19].mxu1 }
 0x8e1   : > { %v1120_v2 = vpop.xlane.xlu1 %1119 }
 0x8e2   : > { %1726 = vrcp.f32 %v1120_v2 }
 0x8ec   : > { %v1727_v3 = vpop.eup %1726 }
 0x928   : > { %v1163_v4 = vpop.f32.mrb[20].mxu1 }
 0x929   : > { %v1169_v5 = vmul.f32 %v1727_v3, %v1163_v4  ;;  %v1550_v6 = vpop.f32.mrb[21].mxu1 }
 0x92a   : > { %v1166_v7 = vpop.f32.mrb[22].mxu1 }
 0x92b   : > { %v1170_v8 = vpack.c.bf16 %v1169_v5, %v1169_v5  ;;  %v1551_v9 = vpop.f32.mrb[23].mxu1 }
 0x92d   : > { %1555 = vmatmul.mubr.msk.bf16.vlgmr.msra.gmra.mrb[24].mxu0 %vm597_vm3, %v1170_v8 }
 0xa00   : > { %v1211_v10 = vpop.f32.mrb[24].mxu0 }
 0xa01   : > { %v1217_v12 = vadd.f32 %v1211_v10, %v1061_v62  ;;  %v1556_v13 = vpop.f32.mrb[25].mxu0 }
 0xa02   : > { %v1214_v14 = vpop.f32.mrb[26].mxu0 }
 0xa03   : > { %v1225_v15 = vadd.f32 %v1422_v11, %v1217_v12  ;;  %v1557_v16 = vpop.f32.mrb[27].mxu0 }
 0xa05   : > { %1226 = vst.msk [vmem:[%s2408_s13] sm:$0xff] %vm546_vm4, %v1225_v15 }
 0xa06   : > { %1885 = shalt.err (!%p1882_p5)
}
 0xa07   : > { %s1886_s2 = scalar_lea.hbm %s2523_s22, 128  ;;  %s1890_s24 = scalar_lea.hbm %s2651_s3, 512 }
 0xa08   : > { %p1887_p13 = scmp.ne.s32.totalorder %s2523_s22, %s1886_s2  ;;  %p1891_p0 = scmp.lt.u32.totalorder %s2523_s22, %s2651_s3 }
 0xa09   : > { %p1892_p8 = scmp.lt.u32.totalorder %s1890_s24, %s1886_s2  ;;  %p1894_p10 = scmp.lt.u32.totalorder %s1886_s2, %s2523_s22 }
 0xa0a   : > { %p1888_p4 = pnand %p1887_p13, %p2652_p1 }
 0xa0b   : > { %p1893_p6 = por %p1892_p8, %p1891_p0 }
 0xa0c   : > { %p1889_p9 = pneg %p1888_p4 }
 0xa0d   : > { %p1895_p3 = por %p1894_p10, %p1893_p6 }
 0xa0f   : > { %p1896_p12 = pnand %p1895_p3, %p1889_p9 }
 0xa11   : > { %1899 = shalt.err (!%p1896_p12)
}
 0xa12   : > { %1574 = dma.vmem_to_hbm [thread:$0]  (%p2652_p1), %s2525_s18, 128, %s2523_s22, %s1228_s20  }
 0xa13 PF: > { %p1604_p2 = scmp.ge.s32.totalorder %s2006_s11, 2  ;;  %s1255_s0 = sand.u32 1, %s1978_s27  }
 0xa14   : > { %p2653_p7 = scmp.ne.s32.totalorder %s2631_s21, 0  ;;  %s1256_s14 = scalar_lea.sflag [#allocation6], %s1255_s0 }
 0xa16   : > { %p1594_p11 = pnand %p1604_p2, %p2653_p7 }
 0xa18   : > { %1961 = dma.done.wait (!%p1594_p11), %s1256_s14, 128  }
 0xa19   : > { %1963 = vsyncadd (!%p1594_p11), %s1256_s14, 4294967168  ;;  %s27_s11 = sadd.s32 1, %s2006_s11   ;;  %s2654_s16 = sld [smem:[#allocation22_spill]] }
 0xa1a   : > { %p24_p5 = scmp.ge.s32.totalorder %s27_s11, 6   ;;  %s2655_s24 = smov %s1970_s25 }
 0xa1b   : > { %s2656_s25 = smov %s1974_s26  ;;  %s2657_s26 = smov %s2277_s19 }
 0xa1c   : > { %s2658_s27 = smov %s1982_s28  ;;  %s2659_s28 = smov %s1986_s29 }
 0xa1d   : > { %s2660_s29 = smov %s2280_s5  ;;  %s2661_s30 = smov %s1998_s9 }
 0xa1e   : > { %s2662_s8 = smov %s2002_s10  ;;  %s2663_s9 = smov %s2666_s17 }
 0xa1f   : > { %s2664_s10 = smov %s2654_s16  ;;  %26 = sbr.rel (!%p24_p5) target bundleno = 20 (0x14), region = 122 }
 0xa26   :  { %1261 = vsyncpa [#allocation5], 1 }
 0xa27   :  { %1263 = vsyncpa [#allocation5 + $0x1], 1 }
 0xa28   :  { %1264 = vsyncpa [#allocation8], 1 }
 0xa29   :  { %1266 = vsyncpa [#allocation8 + $0x1], 1 }
 0xa2a   :  { %1267 = vsyncpa [#allocation11], 1 }
 0xa2b   :  { %1268 = vsyncpa [#allocation6], 1 }
 0xa2c   :  { %1270 = vsyncpa [#allocation6 + $0x1], 1 }

</bundles_post_ra>
